<compile_context>
chip_gen: v5e
topology: v5e:2x2
jax: 0.10.0
libtpu: 0.0.40
codegen_flags: <defaults>
</compile_context>

<pallas_src>
import jax
import jax.numpy as jnp
from jax import lax
from jax.experimental import pallas as pl
from jax.experimental.pallas import tpu as pltpu

MXU_DTYPE = jnp.bfloat16   # matmul operand dtype (f32 accumulation on the MXU)
_F32 = 4                   # bytes per f32


def _pick_divisor(n, candidates):
    for c in candidates:
        if c <= n and n % c == 0:
            return c
    return 1


def _vmem_limit(nbytes):
    """Scoped-VMEM request: 2x headroom over the estimated footprint, floor 16 MiB,
    capped at 48 MiB (below v7x's 64 MiB physical per-TC VMEM)."""
    return int(max(16 << 20, min(2 * nbytes, 48 << 20)))


def _sigmoid(x):
    # sigmoid(x) = 0.5*(tanh(x/2)+1): transcendental goes to the EUP slot and
    # avoids the f32 divide of the logistic form (VALU relief on v5e).
    return 0.5 * (jnp.tanh(0.5 * x) + 1.0)


def _gate_math(state, c_prev, hidden_size):
    """Gate nonlinearities + cell update, all in f32. Gate order: f, i, o, g."""
    H = hidden_size
    f = _sigmoid(state[:, 0 * H:1 * H])
    i = _sigmoid(state[:, 1 * H:2 * H])
    o = _sigmoid(state[:, 2 * H:3 * H])
    g = jnp.tanh(state[:, 3 * H:4 * H])
    cell = f * c_prev + i * g
    hidden = o * jnp.tanh(cell)
    return hidden, cell


def prepare_params(weight, bias, input_size, mxu_dtype=MXU_DTYPE):
    """One-time parameter prep (NOT per step): split + transpose nn.Linear weight.

    weight: (4H, I+H), bias: (4H,)  ->  Wx (I, 4H), Wh (H, 4H), b (1, 4H)."""
    w_t = weight.T                                   # done once at setup
    wx = w_t[:input_size].astype(mxu_dtype)
    wh = w_t[input_size:].astype(mxu_dtype)
    b = bias.reshape(1, -1).astype(jnp.float32)
    return wx, wh, b


# ----------------------- phase 1: hoisted input projection -----------------------

def _proj_kernel(x_ref, wx_ref, b_ref, out_ref):
    mxu = wx_ref.dtype
    out_ref[...] = (jnp.dot(x_ref[...].astype(mxu), wx_ref[...],
                            preferred_element_type=jnp.float32)
                    + b_ref[...]).astype(out_ref.dtype)


def input_projection(xs, wx, b, *, row_tile=None):
    """preact[t, n] = xs[t, n] @ Wx + bias as ONE (T*B, I) x (I, 4H) matmul."""
    T, B, I = xs.shape
    H4 = wx.shape[1]
    M = T * B
    tm = row_tile or _pick_divisor(M, (512, 256, 128, 64, 32, 16, 8))
    assert M % tm == 0
    x2d = xs.reshape(M, I)

    footprint = (wx.size * jnp.dtype(wx.dtype).itemsize          # Wx resident
                 + b.size * _F32                                 # bias resident
                 + 2 * tm * I * jnp.dtype(xs.dtype).itemsize     # x blocks (x2 buf)
                 + 2 * tm * H4 * _F32)                           # out blocks (x2 buf)

    pre = pl.pallas_call(
        _proj_kernel,
        out_shape=jax.ShapeDtypeStruct((M, H4), jnp.float32),
        grid=(M // tm,),
        in_specs=[
            pl.BlockSpec((tm, I), lambda i: (i, 0)),
            pl.BlockSpec((I, H4), lambda i: (0, 0), pipeline_mode=pl.Buffered(1)),
            pl.BlockSpec((1, H4), lambda i: (0, 0), pipeline_mode=pl.Buffered(1)),
        ],
        out_specs=pl.BlockSpec((tm, H4), lambda i: (i, 0)),
        compiler_params=pltpu.CompilerParams(
            dimension_semantics=("parallel",),
            vmem_limit_bytes=_vmem_limit(footprint),
        ),
    )(x2d, wx, b)
    return pre.reshape(T, B, H4)


# ------------------------ phase 2: fused T-step recurrence ------------------------

def lstm_seq_kernel(pre_ref, h0_ref, c0_ref, wh_ref,
                    hs_ref, cfin_ref, h_scr, c_scr):
    tc = pl.program_id(1)
    TT = pre_ref.shape[0]
    H = h0_ref.shape[-1]
    mxu = wh_ref.dtype

    @pl.when(tc == 0)
    def _():
        h_scr[...] = h0_ref[...].astype(jnp.float32)
        c_scr[...] = c0_ref[...].astype(jnp.float32)

    wh = wh_ref[...]  # resident, loaded once per grid step

    def step(i, carry):
        h = h_scr[...]
        c = c_scr[...]
        # serial critical path per timestep: one (tb,H)x(H,4H) matmul + gate math
        state = jnp.dot(h.astype(mxu), wh,
                        preferred_element_type=jnp.float32) + pre_ref[i]
        hidden, cell = _gate_math(state, c, H)
        h_scr[...] = hidden                      # carry across timesteps / grid steps
        c_scr[...] = cell
        hs_ref[i] = hidden.astype(hs_ref.dtype)
        return carry

    lax.fori_loop(0, TT, step, 0, unroll=True)

    @pl.when(tc == pl.num_programs(1) - 1)
    def _():
        cfin_ref[...] = c_scr[...].astype(cfin_ref.dtype)


def lstm_sequence(xs, h0, c0, wx, wh, b, *, batch_tile=None, time_chunk=None):
    """Apply the cell over xs[t] for t = 0..T-1.

    Phase 1: one large MXU matmul for all input projections (+ bias folded in).
    Phase 2: fused recurrence; Wh resident in VMEM, h/c in f32 VMEM scratch."""
    T, B, I = xs.shape
    H = h0.shape[-1]
    assert H % 128 == 0, "hidden_size must be a multiple of 128 (lane-aligned gates)"
    assert wh.shape == (H, 4 * H)

    # >=2 batch programs on the "parallel" axis when B is big enough (v7x megacore)
    tb = batch_tile or (B // 2 if (B >= 16 and B % 2 == 0 and (B // 2) % 8 == 0) else B)
    assert B % tb == 0
    TT = time_chunk or _pick_divisor(T, (8, 4, 2))
    assert T % TT == 0
    grid = (B // tb, T // TT)

    preact = input_projection(xs, wx, b)              # (T, B, 4H) f32

    out_dtype = xs.dtype
    osz = jnp.dtype(out_dtype).itemsize
    footprint = (wh.size * jnp.dtype(wh.dtype).itemsize      # Wh resident, 1 buffer
                 + 2 * TT * tb * 4 * H * _F32                # preact blocks (x2 buf)
                 + 2 * 2 * tb * H * jnp.dtype(h0.dtype).itemsize   # h0/c0 blocks
                 + 2 * TT * tb * H * osz                     # hs blocks (x2 buf)
                 + 2 * tb * H * osz                          # c_final block
                 + 2 * tb * H * _F32)                        # h/c f32 scratch

    hs, c_final = pl.pallas_call(
        lstm_seq_kernel,
        out_shape=(
            jax.ShapeDtypeStruct((T, B, H), out_dtype),
            jax.ShapeDtypeStruct((B, H), out_dtype),
        ),
        grid_spec=pltpu.PrefetchScalarGridSpec(
            num_scalar_prefetch=0,
            grid=grid,
            in_specs=[
                pl.BlockSpec((TT, tb, 4 * H), lambda bi, tc: (tc, bi, 0)),   # preact
                pl.BlockSpec((tb, H), lambda bi, tc: (bi, 0)),               # h0
                pl.BlockSpec((tb, H), lambda bi, tc: (bi, 0)),               # c0
                pl.BlockSpec((H, 4 * H), lambda bi, tc: (0, 0),
                             pipeline_mode=pl.Buffered(1)),                  # Wh resident
            ],
            out_specs=[
                pl.BlockSpec((TT, tb, H), lambda bi, tc: (tc, bi, 0)),       # hidden slab
                pl.BlockSpec((tb, H), lambda bi, tc: (bi, 0)),               # final cell
            ],
            scratch_shapes=[
                pltpu.VMEM((tb, H), jnp.float32),                            # h carry
                pltpu.VMEM((tb, H), jnp.float32),                            # c carry
            ],
        ),
        compiler_params=pltpu.CompilerParams(
            dimension_semantics=("parallel", "arbitrary"),
            vmem_limit_bytes=_vmem_limit(footprint),
        ),
    )(preact, h0, c0, wh)
    return hs, c_final


def lstm_cell(x, prev_hidden, prev_cell, wx, wh, b, **kwargs):
    """Exact equivalent of the module's forward (single timestep) = T=1 sequence."""
    hs, cell = lstm_sequence(x[None], prev_hidden, prev_cell, wx, wh, b, **kwargs)
    return hs[0], cell


# --------------------------------- references ---------------------------------

def lstm_ref(x, prev_hidden, prev_cell, weight, bias):
    """Pure-JAX f32 reference matching the PyTorch forward exactly."""
    xh = jnp.concatenate([x, prev_hidden], axis=-1)
    state = xh @ weight.T + bias
    f, i, o, g = jnp.split(state, 4, axis=-1)
    cell = jax.nn.sigmoid(f) * prev_cell + jax.nn.sigmoid(i) * jnp.tanh(g)
    hidden = jax.nn.sigmoid(o) * jnp.tanh(cell)
    return hidden, cell


def lstm_step_mixed(x, h, c, wx, wh, b):
    """Reference mirroring the kernel math (bf16 MXU operands, f32 gates/carry)."""
    mxu = wx.dtype
    pre = jnp.dot(x.astype(mxu), wx, preferred_element_type=jnp.float32) + b
    state = jnp.dot(h.astype(jnp.float32).astype(mxu), wh,
                    preferred_element_type=jnp.float32) + pre
    return _gate_math(state, c.astype(jnp.float32), c.shape[-1])


# ------------------------------------ main ------------------------------------

if __name__ == "__main__":
    B = 8
    input_size = 64
    hidden_size = 128   # multiple of 128 -> lane-aligned gates, lane-dense stores
    T = 8
    concat_size = input_size + hidden_size

    key = jax.random.PRNGKey(0)
    kx, kh, kc, kw, kb, ks = jax.random.split(key, 6)

    x = jax.random.normal(kx, (B, input_size), dtype=jnp.float32)
    prev_hidden = jax.random.normal(kh, (B, hidden_size), dtype=jnp.float32)
    prev_cell = jax.random.normal(kc, (B, hidden_size), dtype=jnp.float32)
    xs = jax.random.normal(ks, (T, B, input_size), dtype=jnp.float32)

    # nn.Linear default init: U(-1/sqrt(fan_in), 1/sqrt(fan_in))
    bound = 1.0 / float(jnp.sqrt(jnp.float32(concat_size)))
    weight = jax.random.uniform(kw, (4 * hidden_size, concat_size),
                                dtype=jnp.float32, minval=-bound, maxval=bound)
    bias = jax.random.uniform(kb, (4 * hidden_size,),
                              dtype=jnp.float32, minval=-bound, maxval=bound)

    wx, wh, b2d = prepare_params(weight, bias, input_size)

    # ---- single-step cell (the module's forward) ----
    hidden, cell = lstm_cell(x, prev_hidden, prev_cell, wx, wh, b2d)
    jax.block_until_ready((hidden, cell))

    hid_mix, cell_mix = lstm_step_mixed(x, prev_hidden, prev_cell, wx, wh, b2d)
    hid_f32, cell_f32 = lstm_ref(x, prev_hidden, prev_cell, weight, bias)
    assert jnp.allclose(hidden, hid_mix, atol=2e-3, rtol=2e-3)
    assert jnp.allclose(cell, cell_mix, atol=2e-3, rtol=2e-3)
    assert jnp.allclose(hidden, hid_f32, atol=1e-1, rtol=1e-1)  # bf16 MXU drift bound
    assert jnp.allclose(cell, cell_f32, atol=1e-1, rtol=1e-1)

    # ---- fused T-step recurrence (projection hoisted + chunked time loop) ----
    hs, c_final = lstm_sequence(xs, prev_hidden, prev_cell, wx, wh, b2d)
    jax.block_until_ready((hs, c_final))

    # mixed-precision reference (mirrors kernel math) -> tight check
    h_m, c_m = prev_hidden, prev_cell
    hs_m = []
    for t in range(T):
        h_m, c_m = lstm_step_mixed(xs[t], h_m, c_m, wx, wh, b2d)
        hs_m.append(h_m)
    hs_m = jnp.stack(hs_m)
    assert jnp.allclose(hs, hs_m, atol=2e-3, rtol=2e-3)
    assert jnp.allclose(c_final, c_m, atol=2e-3, rtol=2e-3)

    # full-f32 reference (true module semantics) -> loose drift sanity check
    # TODO(synk): for long T use MXU_DTYPE=jnp.float32 to avoid compounding bf16 drift.
    h_f, c_f = prev_hidden, prev_cell
    hs_f = []
    for t in range(T):
        h_f, c_f = lstm_ref(xs[t], h_f, c_f, weight, bias)
        hs_f.append(h_f)
    hs_f = jnp.stack(hs_f)
    assert jnp.allclose(hs, hs_f, atol=1e-1, rtol=1e-1)
    assert jnp.allclose(c_final, c_f, atol=1e-1, rtol=1e-1)

    print("KERNEL_OK")
</pallas_src>

<mosaic_0001>
module attributes {stable_mosaic.version = 11 : i64} {
  func.func @_proj_kernel(%arg0: i32, %arg1: memref<8x64xf32, #tpu.memory_space<vmem>>, %arg2: memref<64x512xbf16, #tpu.memory_space<vmem>>, %arg3: memref<1x512xf32, #tpu.memory_space<vmem>>, %arg4: memref<8x512xf32, #tpu.memory_space<vmem>>) attributes {dimension_semantics = [#tpu.dimension_semantics<parallel>], iteration_bounds = array<i64: 1>, scalar_prefetch = 0 : i64, scratch_operands = 0 : i64, tpu.core_type = #tpu.core_type<tc>, window_params = [{transform_indices = @transform_0, window_bounds = array<i64: 8, 64>}, {pipeline_mode = #tpu.pipeline_mode<synchronous>, transform_indices = @transform_1, window_bounds = array<i64: 64, 512>}, {pipeline_mode = #tpu.pipeline_mode<synchronous>, transform_indices = @transform_2, window_bounds = array<i64: 1, 512>}, {transform_indices = @transform_3, window_bounds = array<i64: 8, 512>}]} {
    %c0 = arith.constant 0 : index
    %c0_0 = arith.constant 0 : index
    %0 = vector.load %arg1[%c0, %c0_0] : memref<8x64xf32, #tpu.memory_space<vmem>>, vector<8x64xf32>
    %1 = arith.truncf %0 : vector<8x64xf32> to vector<8x64xbf16>
    %c0_1 = arith.constant 0 : index
    %c0_2 = arith.constant 0 : index
    %2 = vector.load %arg2[%c0_1, %c0_2] : memref<64x512xbf16, #tpu.memory_space<vmem>>, vector<64x512xbf16>
    %cst = arith.constant dense<0.000000e+00> : vector<8x512xf32>
    %3 = tpu.matmul %1, %2, %cst {dimension_numbers = #tpu.dot_dimension_numbers<[1], [0], [0], [1], [0, 0, 1, 1], [], []>} : vector<8x64xbf16>, vector<64x512xbf16>, vector<8x512xf32> -> vector<8x512xf32>
    %c0_3 = arith.constant 0 : index
    %c0_4 = arith.constant 0 : index
    %4 = vector.load %arg3[%c0_3, %c0_4] : memref<1x512xf32, #tpu.memory_space<vmem>>, vector<1x512xf32>
    %5 = vector.broadcast %4 : vector<1x512xf32> to vector<8x512xf32>
    %6 = arith.addf %3, %5 : vector<8x512xf32>
    %c0_5 = arith.constant 0 : index
    %c0_6 = arith.constant 0 : index
    %7 = vector.load %arg4[%c0_5, %c0_6] : memref<8x512xf32, #tpu.memory_space<vmem>>, vector<8x512xf32>
    tpu.vector_store %arg4[%c0_5, %c0_6], %6 {strides = array<i32>} : memref<8x512xf32, #tpu.memory_space<vmem>>, vector<8x512xf32>,
    return
  }
  func.func @transform_0(%arg0: i32) -> (i32, i32) {
    %c0_i32 = arith.constant 0 : i32
    %c0_i32_0 = arith.constant 0 : i32
    return %arg0, %c0_i32 : i32, i32
  }
  func.func @transform_1(%arg0: i32) -> (i32, i32) {
    %c0_i32 = arith.constant 0 : i32
    %c0_i32_0 = arith.constant 0 : i32
    %c0_i32_1 = arith.constant 0 : i32
    return %c0_i32, %c0_i32_0 : i32, i32
  }
  func.func @transform_2(%arg0: i32) -> (i32, i32) {
    %c0_i32 = arith.constant 0 : i32
    %c0_i32_0 = arith.constant 0 : i32
    %c0_i32_1 = arith.constant 0 : i32
    return %c0_i32, %c0_i32_0 : i32, i32
  }
  func.func @transform_3(%arg0: i32) -> (i32, i32) {
    %c0_i32 = arith.constant 0 : i32
    %c0_i32_0 = arith.constant 0 : i32
    return %arg0, %c0_i32 : i32, i32
  }
}

</mosaic_0001>

<bundles_post_ra>
// kernel: tpu_custom_call.1
= control target key start
LH: loop header
LB: loop body
LE: loop exit
PB: predicated region body
PF: predicated region fallthrough
CT: control target
= control target key end

     0   :  { %8 = vsyncpa [#allocation3], 0  ;;  %s475_s0 = inlined_call_operand.hbm [shape: f32[8,64], index: 0, kind: input, shape index: {}]   ;;  %s476_s1 = inlined_call_operand.hbm [shape: bf16[64,512], index: 1, kind: input, shape index: {}]   ;;  %s477_s2 = inlined_call_operand.hbm [shape: f32[1,512], index: 2, kind: input, shape index: {}]   ;;  %s478_s3 = inlined_call_operand.hbm [shape: f32[8,512], index: 3, kind: output, shape index: {}]  }
   0x1   :  { %9 = vsyncpa [#allocation6], 0  ;;  %s26_s14 = sshll.u32 %s476_s1, 4  ;;  %s27_s14 = int_to_ptr.hbm [resolvable:$true] %s26_s14 }
   0x2   :  { %10 = vsyncpa [#allocation4], 0  ;;  %s437_s15 = smov [#allocation5]   ;;  %s16_s19 = sshll.u32 %s475_s0, 4  ;;  %s17_s19 = int_to_ptr.hbm [resolvable:$true] %s16_s19 }
   0x3   :  { %s28_s16 = sshll.u32 %s437_s15, 4  ;;  %s438_s20 = smov 256   ;;  %s29_s16 = int_to_ptr.vmem [resolvable:$true] %s28_s16 }
   0x4   :  { %s439_s21 = smov 16   ;;  %s440_s22 = smov [#allocation2]  }
   0x5   :  { %34 = dma.hbm_to_vmem [thread:$0]  %s27_s14, 2048, %s29_s16, [#allocation6], %s438_s20, %s438_s20, %s439_s21  }
   0x6   :  { %s18_s23 = sshll.u32 %s440_s22, 4  ;;  %s40_s26 = sshll.u32 %s477_s2, 4  ;;  %s19_s23 = int_to_ptr.vmem [resolvable:$true] %s18_s23  ;;  %s41_s26 = int_to_ptr.hbm [resolvable:$true] %s40_s26 }
   0x7   :  { %21 = dma.hbm_to_vmem [thread:$0]  %s17_s19, 128, %s19_s23, [#allocation3]  }
   0x8   :  { %s441_s1 = smov [#allocation7]  }
   0x9   :  { %s42_s27 = sshll.u32 %s441_s1, 4  ;;  %s43_s27 = int_to_ptr.vmem [resolvable:$true] %s42_s27 }
   0xa   :  { %45 = dma.hbm_to_vmem [thread:$0]  %s41_s26, 64, %s43_s27, [#allocation6]  }
   0xb   :  { %431 = dma.done.wait [#allocation3], 128  }
   0xc   :  { %432 = vsyncadd [#allocation3], 4294967168 }
   0xd   :  { %433 = dma.done.wait [#allocation6], 2112  }
   0xe   :  { %434 = vsyncadd [#allocation6], 4294965184  ;;  %v295_v0 = vld [vmem:[#allocation5 + $0x60] sm:$0xf]  ;;  %v327_v1 = vld [vmem:[#allocation5 + $0x6c] sm:$0xf0] }
   0xf   :  { %v325_v2 = vld [vmem:[#allocation5 + $0x64] sm:$0xf]  ;;  %v296_v3 = vor.u32 %v327_v1, %v295_v0  ;;  %v297_v4 = vld [vmem:[#allocation5 + $0x70] sm:$0xf0]  ;;  %v303_v5 = vld [vmem:[#allocation5 + $0x68] sm:$0xf] }
  0x10   :  { %v328_v6 = vld [vmem:[#allocation5 + $0x74] sm:$0xf0]  ;;  %v300_v7 = vor.u32 %v325_v2, %v297_v4  ;;  %v326_v9 = vld [vmem:[#allocation5 + $0x6c] sm:$0xf]  ;;  %v305_v10 = vld [vmem:[#allocation5 + $0x78] sm:$0xf0] }
  0x11   :  { %v304_v8 = vor.u32 %v328_v6, %v303_v5  ;;  %v279_v11 = vld [vmem:[#allocation5 + $0x40] sm:$0xf]  ;;  %175 = vmatpush.bf16.msra.mxu0 %v296_v3  ;;  %v308_v12 = vor.u32 %v326_v9, %v305_v10  ;;  %v323_v13 = vld [vmem:[#allocation5 + $0x4c] sm:$0xf0]  ;;  %v321_v14 = vld [vmem:[#allocation5 + $0x44] sm:$0xf] }
  0x12   :  { %v281_v15 = vld [vmem:[#allocation5 + $0x50] sm:$0xf0]  ;;  %188 = vmatpush.bf16.msra.mxu1 %v300_v7  ;;  %v280_v16 = vor.u32 %v323_v13, %v279_v11  ;;  %v287_v18 = vld [vmem:[#allocation5 + $0x48] sm:$0xf]  ;;  %v324_v19 = vld [vmem:[#allocation5 + $0x54] sm:$0xf0] }
  0x13   :  { %201 = vmatpush.bf16.msra.mxu2 %v304_v8  ;;  %v284_v17 = vor.u32 %v321_v14, %v281_v15  ;;  %v322_v20 = vld [vmem:[#allocation5 + $0x4c] sm:$0xf]  ;;  %214 = vmatpush.bf16.msra.mxu3 %v308_v12  ;;  %v288_v21 = vor.u32 %v324_v19, %v287_v18  ;;  %v289_v22 = vld [vmem:[#allocation5 + $0x58] sm:$0xf0]  ;;  %v263_v23 = vld [vmem:[#allocation5 + $0x20] sm:$0xf] }
  0x14   :  { %v319_v24 = vld [vmem:[#allocation5 + $0x2c] sm:$0xf0]  ;;  %v292_v25 = vor.u32 %v322_v20, %v289_v22  ;;  %v317_v26 = vld [vmem:[#allocation5 + $0x24] sm:$0xf]  ;;  %v265_v27 = vld [vmem:[#allocation5 + $0x30] sm:$0xf0] }
  0x15   :  { %v271_v28 = vld [vmem:[#allocation5 + $0x28] sm:$0xf]  ;;  %176 = vmatpush.bf16.msra.mxu0 %v280_v16  ;;  %v264_v29 = vor.u32 %v319_v24, %v263_v23  ;;  %v320_v30 = vld [vmem:[#allocation5 + $0x34] sm:$0xf0]  ;;  %v318_v31 = vld [vmem:[#allocation5 + $0x2c] sm:$0xf]  ;;  %v268_v33 = vor.u32 %v317_v26, %v265_v27 }
  0x16   :  { %v273_v32 = vld [vmem:[#allocation5 + $0x38] sm:$0xf0]  ;;  %189 = vmatpush.bf16.msra.mxu1 %v284_v17  ;;  %v272_v34 = vor.u32 %v320_v30, %v271_v28  ;;  %v247_v35 = vld [vmem:[#allocation5] sm:$0xf]  ;;  %v315_v36 = vld [vmem:[#allocation5 + $0xc] sm:$0xf0] }
  0x17   :  { %202 = vmatpush.bf16.msra.mxu2 %v288_v21  ;;  %v313_v37 = vld [vmem:[#allocation5 + $0x4] sm:$0xf]  ;;  %215 = vmatpush.bf16.msra.mxu3 %v292_v25  ;;  %v276_v38 = vor.u32 %v318_v31, %v273_v32  ;;  %v249_v39 = vld [vmem:[#allocation5 + $0x10] sm:$0xf0]  ;;  %v255_v40 = vld [vmem:[#allocation5 + $0x8] sm:$0xf]  ;;  %v248_v44 = vor.u32 %v315_v36, %v247_v35 }
  0x18   :  { %v316_v41 = vld [vmem:[#allocation5 + $0x14] sm:$0xf0]  ;;  %v314_v42 = vld [vmem:[#allocation5 + $0xc] sm:$0xf]  ;;  %v257_v43 = vld [vmem:[#allocation5 + $0x18] sm:$0xf0]  ;;  %v252_v46 = vor.u32 %v313_v37, %v249_v39 }
  0x19   :  { %177 = vmatpush.bf16.msra.mxu0 %v264_v29  ;;  %v59_v45 = vld [vmem:[#allocation2] sm:$0xff]  ;;  %v256_v47 = vor.u32 %v316_v41, %v255_v40  ;;  %v260_v48 = vor.u32 %v314_v42, %v257_v43  ;;  %vm167_vm0 = vcmask 523264   ;;  %v77_v50 = vld [vmem:[#allocation7] sm:$0xf]  ;;  %s442_s0 = smov [#allocation8]   ;;  %s234_s30 = sshll.u32 %s478_s3, 4  ;;  %s235_s30 = int_to_ptr.hbm [resolvable:$true] %s234_s30 }
  0x1a   :  { %190 = vmatpush.bf16.msra.mxu1 %v268_v33  ;;  %v60_v49 = vpack.c.bf16 %v59_v45, %v59_v45  ;;  %v79_v51 = vperm.slane %v77_v50, 0  ;;  %v80_v52 = vperm.slane %v77_v50, 1  ;;  %v81_v57 = vperm.slane %v77_v50, 2  ;;  %s232_s2 = sshll.u32 %s442_s0, 4  ;;  %s233_s2 = int_to_ptr.vmem [resolvable:$true] %s232_s2 }
  0x1b   :  { %203 = vmatpush.bf16.msra.mxu2 %v272_v34  ;;  %216 = vmatpush.bf16.msra.mxu3 %v276_v38  ;;  %v82_v58 = vperm.slane %v77_v50, 3 }
  0x1d   :  { %178 = vmatpush.bf16.msra.mxu0 %v248_v44 }
  0x1e   :  { %191 = vmatpush.bf16.msra.mxu1 %v252_v46 }
  0x1f   :  { %204 = vmatpush.bf16.msra.mxu2 %v256_v47  ;;  %217 = vmatpush.bf16.msra.mxu3 %v260_v48 }
  0x20   :  { %309 = vmatmul.msk.bf16.vlgmr.msra.gmra.mxu0 %vm167_vm0, %v60_v49 }
  0x21   :  { %310 = vmatmul.msk.bf16.vlgmr.msra.gmra.mxu1 %vm167_vm0, %v60_v49 }
  0x22   :  { %311 = vmatmul.msk.bf16.vlgmr.msra.gmra.mxu2 %vm167_vm0, %v60_v49  ;;  %312 = vmatmul.msk.bf16.vlgmr.msra.gmra.mxu3 %vm167_vm0, %v60_v49 }
  0x9d   :  { %v180_v53 = vpop.f32.mrf.mxu0 }
  0x9e   :  { %v181_v54 = vadd.f32 %v180_v53, %v79_v51  ;;  %v193_v55 = vpop.f32.mrf.mxu1 }
  0x9f   :  { %v194_v56 = vadd.f32 %v193_v55, %v80_v52 }
  0xa0   :  { %223 = vst [vmem:[#allocation8] sm:$0xff] %v181_v54 }
  0xa1   :  { %224 = vst [vmem:[#allocation8 + $0x8] sm:$0xff] %v194_v56 }
  0xa5   :  { %v206_v59 = vpop.f32.mrf.mxu2  ;;  %v219_v61 = vpop.f32.mrf.mxu3 }
  0xa6   :  { %v207_v60 = vadd.f32 %v206_v59, %v81_v57  ;;  %v182_v62 = vpop.f32.mrf.mxu0  ;;  %v220_v63 = vadd.f32 %v219_v61, %v82_v58  ;;  %v195_v0 = vpop.f32.mrf.mxu1 }
  0xa8   :  { %225 = vst [vmem:[#allocation8 + $0x10] sm:$0xff] %v207_v60 }
  0xa9   :  { %226 = vst [vmem:[#allocation8 + $0x18] sm:$0xff] %v220_v63 }
  0xaa   :  { %237 = dma.vmem_to_hbm [thread:$0]  %s233_s2, 512, %s235_s30, [#allocation4]  }
  0xad   :  { %v208_v1 = vpop.f32.mrf.mxu2  ;;  %v221_v2 = vpop.f32.mrf.mxu3 }
  0xae   :  { %435 = dma.done.wait [#allocation4], 512  }
  0xaf   :  { %436 = vsyncadd [#allocation4], 4294966784 }
  0xb0   :  { %242 = vsyncpa [#allocation3], 1 }
  0xb1   :  { %243 = vsyncpa [#allocation6], 1 }
  0xb2   :  { %244 = vsyncpa [#allocation4], 1 }

</bundles_post_ra>
